<compile_context>
chip_gen: v7x
topology: tpu7x:2x2x1
jax: 0.10.0
libtpu: 0.0.40
codegen_flags: <defaults>
</compile_context>

<pallas_src>
import jax
import jax.numpy as jnp
from jax.experimental import pallas as pl
from jax.experimental.pallas import tpu as pltpu


def se_kernel(x_ref, w1_ref, b1_ref, w2_ref, b2_ref, o_ref):
    # x_ref block: (1, C, TB, HW) — TB temporal frames of one sample, HW on lanes.
    x = x_ref[0]                                                    # (C, TB, HW), native dtype
    # AdaptiveAvgPool3d((None, 1, 1)): mean over the spatial (lane) axis, f32 accumulation.
    gc = jnp.mean(x, axis=-1, dtype=jnp.float32)                    # (C, TB)
    # fc[0]: 1x1x1 Conv3d C -> C//r (+ bias), then ReLU.
    h = jnp.dot(w1_ref[...], gc, preferred_element_type=jnp.float32) + b1_ref[...]   # (Cr, TB)
    h = jnp.maximum(h, 0.0)
    # fc[2]: 1x1x1 Conv3d C//r -> C (+ bias), then HSigmoid = relu6(z + 3) / 6.
    z = jnp.dot(w2_ref[...], h, preferred_element_type=jnp.float32) + b2_ref[...]    # (C, TB)
    mask = jnp.clip(z + 3.0, 0.0, 6.0) * (1.0 / 6.0)                # (C, TB) f32
    # mask * x, broadcast over the HW lane axis; multiply in the input dtype.
    o_ref[0] = (x * mask[:, :, None].astype(x.dtype)).astype(o_ref.dtype)


def _pick_tb(T, C, HW, itemsize, tile_budget_bytes):
    """Largest temporal tile TB dividing T whose double-buffered in+out tiles fit the budget."""
    bytes_per_frame = C * HW * itemsize
    max_tb = max(1, tile_budget_bytes // (4 * bytes_per_frame))     # 2 bufs x (in + out)
    divisors = [d for d in range(1, T + 1) if T % d == 0 and d <= max_tb]
    # Prefer sublane-friendly tile sizes (full T, or a multiple of 8).
    preferred = [d for d in divisors if d == T or d % 8 == 0]
    return max(preferred) if preferred else max(divisors)


def se_layer_3d(x, w1, b1, w2, b2):
    """x: (N, C, T, H, W); w1: (Cr, C); b1: (Cr,); w2: (C, Cr); b2: (C,)."""
    N, C, T, H, W = x.shape
    Cr = w1.shape[0]
    HW = H * W
    itemsize = jnp.dtype(x.dtype).itemsize

    # Free reshape (no transpose, no extra HBM traffic): channels stay where PyTorch put them.
    x4 = x.reshape(N, C, T, HW)
    b1c = b1.reshape(Cr, 1)
    b2c = b2.reshape(C, 1)

    # Tile as many temporal frames per grid step as fit in ~20 MiB of VMEM tiles
    # (double-buffered in + out), leaving headroom under the 32 MiB scoped limit.
    # 32 MiB scoped is safe on v5e/v6e (128 MiB physical) and v7x (64 MiB physical).
    tb = _pick_tb(T, C, HW, itemsize, 20 * 1024 * 1024)
    grid = (N, T // tb)

    bytes_accessed = 2 * N * C * T * HW * itemsize + (2 * C * Cr + C + Cr) * 4
    flops = 2 * N * C * T * HW + 4 * N * T * C * Cr

    out = pl.pallas_call(
        se_kernel,
        out_shape=jax.ShapeDtypeStruct((N, C, T, HW), x.dtype),
        grid=grid,
        in_specs=[
            pl.BlockSpec((1, C, tb, HW), lambda n, t: (n, 0, t, 0)),  # x tile (TB frames)
            pl.BlockSpec((Cr, C), lambda n, t: (0, 0)),               # W1 (full, VMEM-resident)
            pl.BlockSpec((Cr, 1), lambda n, t: (0, 0)),               # b1
            pl.BlockSpec((C, Cr), lambda n, t: (0, 0)),               # W2 (full, VMEM-resident)
            pl.BlockSpec((C, 1), lambda n, t: (0, 0)),                # b2
        ],
        out_specs=pl.BlockSpec((1, C, tb, HW), lambda n, t: (n, 0, t, 0)),
        compiler_params=pltpu.CompilerParams(
            dimension_semantics=("parallel", "parallel"),
            vmem_limit_bytes=32 * 1024 * 1024,
        ),
        cost_estimate=pl.CostEstimate(
            flops=flops, transcendentals=0, bytes_accessed=bytes_accessed),
    )(x4, w1, b1c, w2, b2c)

    return out.reshape(N, C, T, H, W)


def se_layer_3d_ref(x, w1, b1, w2, b2):
    """Pure-JAX reference mirroring the PyTorch forward (NCTHW)."""
    gc = jnp.mean(x, axis=(3, 4), keepdims=True)                          # (N,C,T,1,1)
    h = jnp.einsum('oc,nctij->notij', w1, gc) + b1[None, :, None, None, None]
    h = jnp.maximum(h, 0.0)
    z = jnp.einsum('oc,nctij->notij', w2, h) + b2[None, :, None, None, None]
    mask = jnp.clip(z + 3.0, 0.0, 6.0) / 6.0
    return mask * x


if __name__ == "__main__":
    # Small shapes consistent with the module: N=2, C=8, T=4, H=W=8, reduction=4
    N, C, T, H, W = 2, 8, 4, 8, 8
    reduction = 4
    Cr = C // reduction

    key = jax.random.PRNGKey(0)
    kx, k1, k2, k3, k4 = jax.random.split(key, 5)

    x = jax.random.normal(kx, (N, C, T, H, W), dtype=jnp.float32)
    # Deterministic kaiming-style init for the two 1x1x1 conv weights (+ biases)
    w1 = jax.random.normal(k1, (Cr, C), dtype=jnp.float32) * jnp.sqrt(2.0 / C)
    b1 = jax.random.normal(k2, (Cr,), dtype=jnp.float32) * 0.01
    w2 = jax.random.normal(k3, (C, Cr), dtype=jnp.float32) * jnp.sqrt(2.0 / Cr)
    b2 = jax.random.normal(k4, (C,), dtype=jnp.float32) * 0.01

    out = se_layer_3d(x, w1, b1, w2, b2)
    out = jax.block_until_ready(out)

    ref = se_layer_3d_ref(x, w1, b1, w2, b2)
    assert out.shape == (N, C, T, H, W)
    assert jnp.allclose(out, ref, atol=1e-5, rtol=1e-5), "mismatch vs reference"

    print("KERNEL_OK")
</pallas_src>

<mosaic_0001>
module attributes {stable_mosaic.version = 11 : i64} {
  func.func @se_kernel(%arg0: i32, %arg1: i32, %arg2: memref<1x8x4x64xf32, #tpu.memory_space<vmem>>, %arg3: memref<2x8xf32, #tpu.memory_space<vmem>>, %arg4: memref<2x1xf32, #tpu.memory_space<vmem>>, %arg5: memref<8x2xf32, #tpu.memory_space<vmem>>, %arg6: memref<8x1xf32, #tpu.memory_space<vmem>>, %arg7: memref<1x8x4x64xf32, #tpu.memory_space<vmem>>) attributes {dimension_semantics = [#tpu.dimension_semantics<parallel>, #tpu.dimension_semantics<parallel>], iteration_bounds = array<i64: 2, 1>, scalar_prefetch = 0 : i64, scratch_operands = 0 : i64, tpu.core_type = #tpu.core_type<tc>, window_params = [{transform_indices = @transform_0, window_bounds = array<i64: 1, 8, 4, 64>}, {pipeline_mode = #tpu.pipeline_mode<synchronous>, transform_indices = @transform_1, window_bounds = array<i64: 2, 8>}, {pipeline_mode = #tpu.pipeline_mode<synchronous>, transform_indices = @transform_2, window_bounds = array<i64: 2, 1>}, {pipeline_mode = #tpu.pipeline_mode<synchronous>, transform_indices = @transform_3, window_bounds = array<i64: 8, 2>}, {pipeline_mode = #tpu.pipeline_mode<synchronous>, transform_indices = @transform_4, window_bounds = array<i64: 8, 1>}, {transform_indices = @transform_5, window_bounds = array<i64: 1, 8, 4, 64>}]} {
    %c0 = arith.constant 0 : index
    %c0_0 = arith.constant 0 : index
    %c0_1 = arith.constant 0 : index
    %c0_2 = arith.constant 0 : index
    %0 = vector.load %arg2[%c0, %c0_0, %c0_1, %c0_2] : memref<1x8x4x64xf32, #tpu.memory_space<vmem>>, vector<1x8x4x64xf32>
    %1 = vector.shape_cast %0 : vector<1x8x4x64xf32> to vector<8x4x64xf32>
    %cst = arith.constant dense<0.000000e+00> : vector<8x4xf32>
    %2 = vector.multi_reduction <add>, %1, %cst [2] : vector<8x4x64xf32> to vector<8x4xf32>
    %cst_3 = arith.constant 6.400000e+01 : f32
    %3 = vector.broadcast %cst_3 : f32 to vector<8x4xf32>
    %4 = arith.divf %2, %3 : vector<8x4xf32>
    %c0_4 = arith.constant 0 : index
    %c0_5 = arith.constant 0 : index
    %5 = vector.load %arg3[%c0_4, %c0_5] : memref<2x8xf32, #tpu.memory_space<vmem>>, vector<2x8xf32>
    %cst_6 = arith.constant dense<0.000000e+00> : vector<2x4xf32>
    %6 = tpu.matmul %5, %4, %cst_6 {dimension_numbers = #tpu.dot_dimension_numbers<[1], [0], [0], [1], [0, 0, 1, 1], [], []>} : vector<2x8xf32>, vector<8x4xf32>, vector<2x4xf32> -> vector<2x4xf32>
    %c0_7 = arith.constant 0 : index
    %c0_8 = arith.constant 0 : index
    %7 = vector.load %arg4[%c0_7, %c0_8] : memref<2x1xf32, #tpu.memory_space<vmem>>, vector<2x1xf32>
    %8 = vector.broadcast %7 : vector<2x1xf32> to vector<2x4xf32>
    %9 = arith.addf %6, %8 : vector<2x4xf32>
    %cst_9 = arith.constant 0.000000e+00 : f32
    %10 = vector.broadcast %cst_9 : f32 to vector<2x4xf32>
    %11 = arith.maximumf %9, %10 : vector<2x4xf32>
    %c0_10 = arith.constant 0 : index
    %c0_11 = arith.constant 0 : index
    %12 = vector.load %arg5[%c0_10, %c0_11] : memref<8x2xf32, #tpu.memory_space<vmem>>, vector<8x2xf32>
    %cst_12 = arith.constant dense<0.000000e+00> : vector<8x4xf32>
    %13 = tpu.matmul %12, %11, %cst_12 {dimension_numbers = #tpu.dot_dimension_numbers<[1], [0], [0], [1], [0, 0, 1, 1], [], []>} : vector<8x2xf32>, vector<2x4xf32>, vector<8x4xf32> -> vector<8x4xf32>
    %c0_13 = arith.constant 0 : index
    %c0_14 = arith.constant 0 : index
    %14 = vector.load %arg6[%c0_13, %c0_14] : memref<8x1xf32, #tpu.memory_space<vmem>>, vector<8x1xf32>
    %15 = vector.broadcast %14 : vector<8x1xf32> to vector<8x4xf32>
    %16 = arith.addf %13, %15 : vector<8x4xf32>
    %cst_15 = arith.constant 3.000000e+00 : f32
    %17 = vector.broadcast %cst_15 : f32 to vector<8x4xf32>
    %18 = arith.addf %16, %17 : vector<8x4xf32>
    %cst_16 = arith.constant 0.000000e+00 : f32
    %cst_17 = arith.constant 6.000000e+00 : f32
    %19 = vector.broadcast %cst_16 : f32 to vector<8x4xf32>
    %20 = arith.maximumf %19, %18 : vector<8x4xf32>
    %21 = vector.broadcast %cst_17 : f32 to vector<8x4xf32>
    %22 = arith.minimumf %21, %20 : vector<8x4xf32>
    %cst_18 = arith.constant 0.166666672 : f32
    %23 = vector.broadcast %cst_18 : f32 to vector<8x4xf32>
    %24 = arith.mulf %22, %23 : vector<8x4xf32>
    %25 = vector.shape_cast %24 : vector<8x4xf32> to vector<8x4x1xf32>
    %26 = vector.broadcast %25 : vector<8x4x1xf32> to vector<8x4x64xf32>
    %27 = arith.mulf %1, %26 : vector<8x4x64xf32>
    %c0_19 = arith.constant 0 : index
    %c0_20 = arith.constant 0 : index
    %c0_21 = arith.constant 0 : index
    %c0_22 = arith.constant 0 : index
    %28 = vector.load %arg7[%c0_19, %c0_20, %c0_21, %c0_22] : memref<1x8x4x64xf32, #tpu.memory_space<vmem>>, vector<1x8x4x64xf32>
    %29 = vector.shape_cast %28 : vector<1x8x4x64xf32> to vector<8x4x64xf32>
    %30 = vector.shape_cast %27 : vector<8x4x64xf32> to vector<1x8x4x64xf32>
    tpu.vector_store %arg7[%c0_19, %c0_20, %c0_21, %c0_22], %30 {strides = array<i32>} : memref<1x8x4x64xf32, #tpu.memory_space<vmem>>, vector<1x8x4x64xf32>,
    return
  }
  func.func @transform_0(%arg0: i32, %arg1: i32) -> (i32, i32, i32, i32) {
    %c0_i32 = arith.constant 0 : i32
    %c0_i32_0 = arith.constant 0 : i32
    %c0_i32_1 = arith.constant 0 : i32
    return %arg0, %c0_i32, %arg1, %c0_i32_0 : i32, i32, i32, i32
  }
  func.func @transform_1(%arg0: i32, %arg1: i32) -> (i32, i32) {
    %c0_i32 = arith.constant 0 : i32
    %c0_i32_0 = arith.constant 0 : i32
    %c0_i32_1 = arith.constant 0 : i32
    return %c0_i32, %c0_i32_0 : i32, i32
  }
  func.func @transform_2(%arg0: i32, %arg1: i32) -> (i32, i32) {
    %c0_i32 = arith.constant 0 : i32
    %c0_i32_0 = arith.constant 0 : i32
    %c0_i32_1 = arith.constant 0 : i32
    return %c0_i32, %c0_i32_0 : i32, i32
  }
  func.func @transform_3(%arg0: i32, %arg1: i32) -> (i32, i32) {
    %c0_i32 = arith.constant 0 : i32
    %c0_i32_0 = arith.constant 0 : i32
    %c0_i32_1 = arith.constant 0 : i32
    return %c0_i32, %c0_i32_0 : i32, i32
  }
  func.func @transform_4(%arg0: i32, %arg1: i32) -> (i32, i32) {
    %c0_i32 = arith.constant 0 : i32
    %c0_i32_0 = arith.constant 0 : i32
    %c0_i32_1 = arith.constant 0 : i32
    return %c0_i32, %c0_i32_0 : i32, i32
  }
  func.func @transform_5(%arg0: i32, %arg1: i32) -> (i32, i32, i32, i32) {
    %c0_i32 = arith.constant 0 : i32
    %c0_i32_0 = arith.constant 0 : i32
    %c0_i32_1 = arith.constant 0 : i32
    return %arg0, %c0_i32, %arg1, %c0_i32_0 : i32, i32, i32, i32
  }
}

</mosaic_0001>

<bundles_post_ra>
// kernel: tpu_custom_call.1
= control target key start
LH: loop header
LB: loop body
LE: loop exit
PB: predicated region body
PF: predicated region fallthrough
CT: control target
= control target key end

     0   :  { %10 = vsyncpa [#allocation3], 0  ;;  %s1210_s0 = inlined_call_operand.hbm [shape: f32[2,8,4,64], index: 0, kind: input, shape index: {}]   ;;  %s1211_s1 = inlined_call_operand.vmem [shape: f32[2,8], index: 1, kind: input, shape index: {}]   ;;  %s1212_s2 = inlined_call_operand.vmem [shape: f32[2,1], index: 2, kind: input, shape index: {}]   ;;  %s1213_s3 = inlined_call_operand.vmem [shape: f32[8,2], index: 3, kind: input, shape index: {}]   ;;  %s1214_s4 = inlined_call_operand.vmem [shape: f32[8,1], index: 4, kind: input, shape index: {}]   ;;  %s1215_s5 = inlined_call_operand.hbm [shape: f32[2,8,4,64], index: 5, kind: output, shape index: {}]  }
   0x1   :  { %12 = vsyncpa [#allocation3 + $0x1], 0 }
   0x2   :  { %13 = vsyncpa [#allocation4], 0 }
   0x3   :  { %15 = vsyncpa [#allocation4 + $0x1], 0  ;;  %s960_s18 = smov 0   ;;  %s962_s19 = smov 0  }
   0x4   :  { %s964_s20 = smov 0   ;;  %s966_s21 = smov 0  }
   0x5   :  { %s968_s22 = smov 0   ;;  %s970_s23 = smov 0  }
   0x6 LB: > { %s702_s24 = sadd.s32 4294967295, %s919_s23   ;;  %s703_s25 = sadd.s32 4294967294, %s919_s23   ;;  %s919_s23 = sphi %s970_s23, %s21_s23   ;;  %s915_s22 = sphi %s968_s22, %s1230_s22   ;;  %s911_s21 = sphi %s966_s21, %s1229_s21   ;;  %s907_s20 = sphi %s964_s20, %s1228_s20   ;;  %s903_s19 = sphi %s962_s19, %s1227_s19   ;;  %s899_s18 = sphi %s960_s18, %s1226_s18  }
   0x7   : > { %s33_s26 = sadd.s32 1, %s915_s22  ;;  %s42_s27 = sadd.s32 1, %s907_s20 }
   0x8   : > { %p35_p0 = scmp.ge.s32.totalorder %s33_s26, 2  ;;  %p49_p1 = scmp.ne.s32.totalorder %s907_s20, %s903_s19 }
   0x9   : > { %p50_p2 = scmp.eq.s32.totalorder %s919_s23, 0  ;;  %p55_p3 = scmp.ne.s32.totalorder %s903_s19, %s899_s18 }
   0xa   : > { %s1232_s26 = smov (%p35_p0, %s33_s26), 0  ;;  %p56_p5 = scmp.eq.s32.totalorder %s702_s24, 0 }
   0xb   : > { %p1001_p4 = por %p50_p2, %p49_p1  ;;  %s37_s29 = ssub.s32 %s915_s22, %s1232_s26 }
   0xc   : > { %p165_p6 = scmp.eq.s32.totalorder %s702_s24, 1  ;;  %p40_p7 = scmp.eq.s32.totalorder %s37_s29, 0 }
   0xd   : > { %p1007_p8 = por %p56_p5, %p55_p3  ;;  %p171_p10 = scmp.eq.s32.totalorder %s703_s25, 1 }
   0xe   : > { %p1011_p9 = por %p165_p6, %p49_p1  ;;  %p748_p13 = scmp.lt.s32.totalorder %s919_s23, 2 }
   0xf   : > { %s1016_s7 = scalar_select %p40_p7, %s907_s20, %s42_s27  }
  0x10   : > { %s1219_s6 = scalar_select %p1011_p9, 1, 0 }
  0x11   : > { %p1018_p11 = por %p171_p10, %p55_p3  ;;  %s203_s9 = sand.u32 1, %s907_s20  }
  0x12   : > { %s706_s10 = sshll.u32 %s203_s9, 5  ;;  %s720_s11 = sshll.u32 %s915_s22, 9 }
  0x13   : > { %s1220_s8 = scalar_select %p1018_p11, 1, 0 }
  0x14   : > { %s1029_s14 = scalar_lea.hbm %s1210_s0, %s720_s11  ;;  %s207_s15 = scalar_lea.vmem [#allocation2], %s706_s10 }
  0x15   : > { %s215_s16 = sshll.u32 %s207_s15, 4  ;;  %p1035_p0 = pnand %p748_p13, %p1001_p4  ;;  %s1031_s16 = int_to_ptr.vmem [resolvable:$true] %s215_s16 }
  0x16   : > { %s1040_s24 = scalar_lea.sflag [#allocation3], %s203_s9  ;;  %s807_s25 = scalar_lea.hbm %s1029_s14, 512 }
  0x17   : > { %p808_p2 = scmp.ne.s32.totalorder %s1029_s14, %s807_s25  ;;  %p809_p3 = pneg %p1035_p0 }
  0x18   : > { %s812_s28 = scalar_lea.hbm %s1210_s0, 1024  ;;  %p813_p4 = scmp.lt.u32.totalorder %s1029_s14, %s1210_s0 }
  0x19   : > { %p810_p5 = pnand %p809_p3, %p808_p2  ;;  %p814_p7 = scmp.lt.u32.totalorder %s812_s28, %s807_s25 }
  0x1a   : > { %p816_p13 = scmp.lt.u32.totalorder %s807_s25, %s1029_s14 }
  0x1b   : > { %p811_p6 = pneg %p810_p5  ;;  %p815_p10 = por %p814_p7, %p813_p4 }
  0x1d   : > { %p817_p12 = por %p816_p13, %p815_p10 }
  0x1f   : > { %p818_p1 = pnand %p817_p12, %p811_p6 }
  0x21   : > { %821 = shalt.err (!%p818_p1)
}
  0x22   : > { %s822_s9 = scalar_lea.vmem %s1031_s16, 512  ;;  %s921_s12 = smov [#allocation2]  }
  0x23   : > { %p823_p2 = scmp.ne.s32.totalorder %s1031_s16, %s822_s9  ;;  %s827_s13 = sshll.u32 %s921_s12, 4  ;;  %s828_s13 = int_to_ptr.vmem [resolvable:$false] %s827_s13 }
  0x24   : > { %s829_s15 = scalar_lea.vmem %s828_s13, 1024  ;;  %p830_p9 = scmp.lt.s32.totalorder %s1031_s16, %s828_s13 }
  0x25   : > { %p825_p5 = pnand %p823_p2, %p809_p3  ;;  %p831_p4 = scmp.lt.s32.totalorder %s829_s15, %s822_s9 }
  0x27   : > { %p826_p11 = pneg %p825_p5  ;;  %p832_p7 = por %p831_p4, %p830_p9 }
  0x29   : > { %p833_p10 = pnand %p832_p7, %p826_p11 }
  0x2b   : > { %836 = shalt.err (!%p833_p10)
}
  0x2c   : > { %s922_s25 = smov 64   ;;  %s923_s27 = smov 4  }
  0x2d   : > { %743 = dma.hbm_to_vmem [thread:$0]  (!%p1035_p0), %s1029_s14, 512, %s1031_s16, %s1040_s24, %s922_s25, %s922_s25, %s923_s27  }
  0x2e   : > { %p223_p12 = scmp.lt.s32.totalorder %s919_s23, 3  ;;  %p1222_p1 = scmp.ge.s32.totalorder %s919_s23, 1 }
  0x30   : > { %p224_p3 = pnand %p1222_p1, %p223_p12 }
  0x31   : > { %s1072_s29 = sand.u32 (!%p224_p3), 1, %s903_s19  }
  0x32   : > { %227 = sbr.rel (%p224_p3) target bundleno = 818 (0x332), region = 40  ;;  %s710_s28 = sshll.u32 (!%p224_p3), %s1072_s29, 5 }
  0x33   : > { %s230_s10 = scalar_lea.sflag (!%p224_p3), [#allocation3], %s1072_s29  ;;  %s233_s11 = scalar_lea.vmem (!%p224_p3), [#allocation2], %s710_s28 }
  0x39   : > { %890 = dma.done.wait (%p1007_p8), %s230_s10, 512  }
  0x3a   : > { %892 = vsyncadd (%p1007_p8), %s230_s10, 4294966784  ;;  %vm268_vm0 = vcmask 519168   ;;  %v1082_v0 = vld [vmem:[%s233_s11] sm:$0xf]  ;;  %v1084_v1 = vld [vmem:[%s233_s11 + $0x8] sm:$0xf]  ;;  %v317_v19 = vlaneseq }
  0x3b   : > { %v1086_v2 = vld [vmem:[%s233_s11 + $0x4] sm:$0xf]  ;;  %v269_v3 = vsel %vm268_vm0, %v1082_v0, 0.0  ;;  %v275_v4 = vsel %vm268_vm0, %v1084_v1, 0.0  ;;  %v1092_v5 = vld [vmem:[%s233_s11 + $0xc] sm:$0xf] }
  0x3c   : > { %270 = vadd.xlane.f32.xlu0 %v269_v3  ;;  %276 = vadd.xlane.f32.xlu1 %v275_v4  ;;  %v272_v6 = vsel %vm268_vm0, %v1086_v2, 0.0  ;;  %v278_v7 = vsel %vm268_vm0, %v1092_v5, 0.0  ;;  %v1098_v8 = vld [vmem:[%s233_s11 + $0x10] sm:$0xf]  ;;  %v1100_v9 = vld [vmem:[%s233_s11 + $0x14] sm:$0xf] }
  0x3d   : > { %v281_v10 = vsel %vm268_vm0, %v1098_v8, 0.0  ;;  %v284_v11 = vsel %vm268_vm0, %v1100_v9, 0.0  ;;  %v1106_v12 = vld [vmem:[%s233_s11 + $0x18] sm:$0xf]  ;;  %v1108_v13 = vld [vmem:[%s233_s11 + $0x1c] sm:$0xf] }
  0x3e   : > { %v287_v14 = vsel %vm268_vm0, %v1106_v12, 0.0  ;;  %v290_v15 = vsel %vm268_vm0, %v1108_v13, 0.0  ;;  %v924_v16 = vmov 0.0   ;;  %vm925_vm1 = vmmov 0   ;;  %v303_v17 = vld [vmem:[%s1212_s2] sm:$0x3] }
  0x3f   : > { %726 = vmatprep.subr.mxu0 %v924_v16  ;;  %731 = vmatprep.subr.mxu1 %v924_v16  ;;  %v926_v18 = vmov 0   ;;  %v318_v20 = vand.u32 127, %v317_v19  ;;  %v1117_v21 = vshrl.u32 %v317_v19, 7  ;;  %vm351_vm2 = vcmask 1041409   ;;  %v302_v53 = vld [vmem:[%s1211_s1] sm:$0x3] }
  0x40   : > { %273 = vadd.xlane.f32.xlu0 %v272_v6  ;;  %279 = vadd.xlane.f32.xlu1 %v278_v7  ;;  %vm353_vm3 = vcmask 1042434   ;;  %vm355_vm4 = vcmask 1043459   ;;  %vm357_vm5 = vcmask 1044484   ;;  %vm359_vm6 = vcmask 1045509   ;;  %v442_v55 = vld [vmem:[%s1214_s4] sm:$0xff]  ;;  %s259_s15 = scalar_lea.vmem [#allocation5], %s710_s28 }
  0x41   : > { %728 = vmatprep.mubr.msk.f32.mxu0 %vm925_vm1, %v924_v16  ;;  %733 = vmatprep.mubr.msk.f32.mxu1 %vm925_vm1, %v924_v16  ;;  %v321_v24 = vsub.s32 %v318_v20, %v1117_v21  ;;  %vm361_vm7 = vcmask 1046534   ;;  %vm363_vm8 = vcmask 1047559   ;;  %vm366_vm9 = vcmask 64512   ;;  %v441_v61 = vld [vmem:[%s1213_s3] sm:$0xff]  ;;  %s721_s25 = sshll.u32 %s911_s21, 9  ;;  %s617_s27 = sshll.u32 %s259_s15, 4  ;;  %s1159_s27 = int_to_ptr.vmem [resolvable:$true] %s617_s27 }
  0x42   : > { %805 = vset.pattern.permute.xlu0 %v926_v18  ;;  %806 = vset.pattern.permute.xlu1 %v926_v18  ;;  %vm452_vm10 = vcmask 1041408   ;;  %vm448_vm11 = vcmask 15360   ;;  %v539_v18 = vsub.s32 1, %v1117_v21  ;;  %v546_v20 = vsub.s32 2, %v1117_v21  ;;  %s1157_s11 = scalar_lea.hbm %s1215_s5, %s721_s25  ;;  %s603_s30 = scalar_lea.sflag [#allocation4], %s1072_s29 }
  0x43   : > { %s837_s21 = scalar_lea.vmem %s1159_s27, 512  ;;  %p1223_p9 = scmp.ne.s32.totalorder %s1219_s6, 0 }
  0x44   : > { %282 = vadd.xlane.f32.xlu0 %v281_v10  ;;  %285 = vadd.xlane.f32.xlu1 %v284_v11  ;;  %v581_v11 = vsub.s32 7, %v1117_v21  ;;  %p838_p8 = scmp.ne.s32.totalorder %s1159_s27, %s837_s21  ;;  %s927_s14 = smov [#allocation5]  }
  0x45   : > { %s841_s16 = sshll.u32 %s927_s14, 4  ;;  %s842_s16 = int_to_ptr.vmem [resolvable:$false] %s841_s16 }
  0x46   : > { %p839_p11 = pnand %p838_p8, %p1223_p9  ;;  %s843_s17 = scalar_lea.vmem %s842_s16, 1024 }
  0x47   : > { %p844_p6 = scmp.lt.s32.totalorder %s1159_s27, %s842_s16  ;;  %p845_p13 = scmp.lt.s32.totalorder %s843_s17, %s837_s21 }
  0x48   : > { %288 = vadd.xlane.f32.xlu0 %v287_v14  ;;  %291 = vadd.xlane.f32.xlu1 %v290_v15  ;;  %v532_v14 = vsub.s32 0, %v1117_v21  ;;  %p840_p0 = pneg %p839_p11 }
  0x49   : > { %p846_p2 = por %p845_p13, %p844_p6 }
  0x4b   : > { %p847_p5 = pnand %p846_p2, %p840_p0 }
  0x59   : > { %445 = vperm.xlu1 %806, %v442_v55  }
  0x5e   : > { %306 = vperm.xlu0 %805, %v303_v17  }
  0xc9   : > { %v271_v22 = vpop.xlane.xlu0 %270  ;;  %v277_v23 = vpop.xlane.xlu1 %276 }
  0xca   : > { %v294_v25 = vmul.f32 0.015625, %v271_v22  ;;  %v296_v26 = vmul.f32 0.015625, %v277_v23  ;;  %v553_v23 = vsub.s32 3, %v1117_v21 }
  0xcc   : > { %v322_v31 = vrot.slane %v294_v25, %v321_v24  ;;  %v330_v34 = vrot.slane %v296_v26, %v321_v24  ;;  %v560_v25 = vsub.s32 4, %v1117_v21 }
  0xcd   : > { %v274_v27 = vpop.xlane.xlu0 %273  ;;  %v280_v28 = vpop.xlane.xlu1 %279 }
  0xce   : > { %v295_v29 = vmul.f32 0.015625, %v274_v27  ;;  %v297_v30 = vmul.f32 0.015625, %v280_v28  ;;  %v567_v27 = vsub.s32 5, %v1117_v21 }
  0xd0   : > { %v326_v32 = vrot.slane %v295_v29, %v321_v24  ;;  %v334_v33 = vrot.slane %v297_v30, %v321_v24  ;;  %v574_v29 = vsub.s32 6, %v1117_v21 }
  0xd1   : > { %v283_v35 = vpop.xlane.xlu0 %282  ;;  %v286_v36 = vpop.xlane.xlu1 %285 }
  0xd2   : > { %v352_v37 = vsel %vm351_vm2, %v326_v32, %v322_v31  ;;  %v298_v38 = vmul.f32 0.015625, %v283_v35  ;;  %v299_v39 = vmul.f32 0.015625, %v286_v36 }
  0xd3   : > { %v354_v40 = vsel %vm353_vm3, %v330_v34, %v352_v37 }
  0xd4   : > { %v356_v41 = vsel %vm355_vm4, %v334_v33, %v354_v40  ;;  %v338_v42 = vrot.slane %v298_v38, %v321_v24  ;;  %v342_v43 = vrot.slane %v299_v39, %v321_v24 }
  0xd5   : > { %v289_v44 = vpop.xlane.xlu0 %288  ;;  %v292_v45 = vpop.xlane.xlu1 %291 }
  0xd6   : > { %v358_v46 = vsel %vm357_vm5, %v338_v42, %v356_v41  ;;  %v300_v47 = vmul.f32 0.015625, %v289_v44  ;;  %v301_v48 = vmul.f32 0.015625, %v292_v45 }
  0xd7   : > { %v360_v51 = vsel %vm359_vm6, %v342_v43, %v358_v46 }
  0xd8   : > { %v346_v49 = vrot.slane %v300_v47, %v321_v24  ;;  %v350_v50 = vrot.slane %v301_v48, %v321_v24 }
  0xd9   : > { %v446_v62 = vpop.permute.xlu1 %445 }
  0xda   : > { %v362_v52 = vsel %vm361_vm7, %v346_v49, %v360_v51 }
  0xdb   : > { %v364_v54 = vsel %vm363_vm8, %v350_v50, %v362_v52 }
  0xdc   : > { %727 = vmatpush3.msra.mxu0 %v364_v54 }
  0xdd   : > { %729 = vmatmul.mubr.msk.f32.vlgmr.msra.gmra.mrb[0].mxu0 %vm366_vm9, %v302_v53  ;;  %v307_v56 = vpop.permute.xlu0 %306 }
 0x1b0   : > { %v436_v57 = vpop.f32.mrb[0].mxu0 }
 0x1b1   : > { %v437_v58 = vadd.f32 %v436_v57, %v307_v56  ;;  %v730_v59 = vpop.f32.mrb[1].mxu0 }
 0x1b3   : > { %v440_v60 = vmax.f32 %v437_v58, 0.0 }
 0x1b5   : > { %732 = vmatpush3.msk.msra.mxu1 %vm452_vm10, %v440_v60 }
 0x1b6   : > { %734 = vmatmul.mubr.msk.f32.vlgmr.msra.gmra.mrb[0].mxu1 %vm448_vm11, %v441_v61 }
 0x289   : > { %v522_v63 = vpop.f32.mrb[0].mxu1 }
 0x28a   : > { %v523_v3 = vadd.f32 %v522_v63, %v446_v62  ;;  %v735_v4 = vpop.f32.mrb[1].mxu1 }
 0x28c   : > { %v526_v6 = vadd.f32 3.0, %v523_v3 }
 0x28e   : > { %v527_v7 = vmax.f32 %v526_v6, 0.0 }
 0x290   : > { %v528_v10 = vmin.f32 %v527_v7, 6.0 }
 0x292   : > { %v529_v15 = vmul.f32 0.16666667, %v528_v10 }
 0x294   : > { %v582_v16 = vrot.slane %v529_v15, %v581_v11  ;;  %v533_v17 = vrot.slane %v529_v15, %v532_v14  ;;  %v540_v19 = vrot.slane %v529_v15, %v539_v18  ;;  %v547_v22 = vrot.slane %v529_v15, %v546_v20 }
 0x295   : > { %v554_v24 = vrot.slane %v529_v15, %v553_v23  ;;  %v561_v26 = vrot.slane %v529_v15, %v560_v25  ;;  %v568_v28 = vrot.slane %v529_v15, %v567_v27  ;;  %v575_v30 = vrot.slane %v529_v15, %v574_v29 }
 0x296   : > { %584 = vbcast.lane.b32.xlu0 %v582_v16, 256  ;;  %535 = vbcast.lane.b32.xlu1 %v533_v17, 256 }
 0x29a   : > { %542 = vbcast.lane.b32.xlu1 %v540_v19, 256 }
 0x29e   : > { %549 = vbcast.lane.b32.xlu1 %v547_v22, 256 }
 0x2a2   : > { %556 = vbcast.lane.b32.xlu1 %v554_v24, 256 }
 0x2a6   : > { %563 = vbcast.lane.b32.xlu1 %v561_v26, 256 }
 0x2aa   : > { %570 = vbcast.lane.b32.xlu1 %v568_v28, 256 }
 0x2ae   : > { %577 = vbcast.lane.b32.xlu1 %v575_v30, 256 }
 0x308   : > { %v585_v31 = vpop.permute.xlu0 %584  ;;  %v536_v32 = vpop.permute.xlu1 %535 }
 0x309   : > { %v593_v33 = vmul.f32 %v585_v31, %v1108_v13  ;;  %v586_v34 = vmul.f32 %v536_v32, %v1082_v0 }
 0x30b   : > { %601 = vst.msk [vmem:[%s259_s15 + $0x1c] sm:$0xf] %vm268_vm0, %v593_v33  ;;  %594 = vst.msk [vmem:[%s259_s15] sm:$0xf] %vm268_vm0, %v586_v34 }
 0x30c   : > { %v543_v35 = vpop.permute.xlu1 %542 }
 0x30d   : > { %v587_v36 = vmul.f32 %v543_v35, %v1086_v2 }
 0x30f   : > { %595 = vst.msk [vmem:[%s259_s15 + $0x4] sm:$0xf] %vm268_vm0, %v587_v36 }
 0x310   : > { %v550_v21 = vpop.permute.xlu1 %549 }
 0x311   : > { %v588_v37 = vmul.f32 %v550_v21, %v1084_v1 }
 0x313   : > { %596 = vst.msk [vmem:[%s259_s15 + $0x8] sm:$0xf] %vm268_vm0, %v588_v37 }
 0x314   : > { %v557_v13 = vpop.permute.xlu1 %556 }
 0x315   : > { %v589_v0 = vmul.f32 %v557_v13, %v1092_v5 }
 0x317   : > { %597 = vst.msk [vmem:[%s259_s15 + $0xc] sm:$0xf] %vm268_vm0, %v589_v0 }
 0x318   : > { %v564_v38 = vpop.permute.xlu1 %563 }
 0x319   : > { %v590_v39 = vmul.f32 %v564_v38, %v1098_v8 }
 0x31b   : > { %598 = vst.msk [vmem:[%s259_s15 + $0x10] sm:$0xf] %vm268_vm0, %v590_v39 }
 0x31c   : > { %v571_v2 = vpop.permute.xlu1 %570 }
 0x31d   : > { %v591_v40 = vmul.f32 %v571_v2, %v1100_v9 }
 0x31f   : > { %599 = vst.msk [vmem:[%s259_s15 + $0x14] sm:$0xf] %vm268_vm0, %v591_v40 }
 0x320   : > { %v578_v1 = vpop.permute.xlu1 %577 }
 0x321   : > { %v592_v5 = vmul.f32 %v578_v1, %v1106_v12 }
 0x323   : > { %600 = vst.msk [vmem:[%s259_s15 + $0x18] sm:$0xf] %vm268_vm0, %v592_v5 }
 0x324   : > { %850 = shalt.err (!%p847_p5)
}
 0x325   : > { %s851_s24 = scalar_lea.hbm %s1157_s11, 512  ;;  %s855_s13 = scalar_lea.hbm %s1215_s5, 1024 }
 0x326   : > { %p852_p4 = scmp.ne.s32.totalorder %s1157_s11, %s851_s24  ;;  %p856_p12 = scmp.lt.u32.totalorder %s1157_s11, %s1215_s5 }
 0x327   : > { %p857_p1 = scmp.lt.u32.totalorder %s855_s13, %s851_s24  ;;  %p859_p8 = scmp.lt.u32.totalorder %s851_s24, %s1157_s11 }
 0x328   : > { %p853_p7 = pnand %p852_p4, %p1223_p9 }
 0x329   : > { %p858_p3 = por %p857_p1, %p856_p12 }
 0x32a   : > { %p854_p10 = pneg %p853_p7 }
 0x32b   : > { %p860_p11 = por %p859_p8, %p858_p3 }
 0x32d   : > { %p861_p0 = pnand %p860_p11, %p854_p10 }
 0x32f   : > { %864 = shalt.err (!%p861_p0)
}
 0x330   : > { %s928_s28 = smov 64   ;;  %s929_s10 = smov 4  }
 0x331   : > { %738 = dma.vmem_to_hbm [thread:$0]  (%p1223_p9), %s1159_s27, 512, %s1157_s11, %s603_s30, %s928_s28, %s928_s28, %s929_s10  }
 0x332 PF: > { %s632_s21 = sand.u32 1, %s899_s18   ;;  %p1224_p6 = scmp.ne.s32.totalorder %s1220_s8, 0 }
 0x333   : > { %p1225_p13 = scmp.ge.s32.totalorder %s919_s23, 2  ;;  %s633_s14 = scalar_lea.sflag [#allocation4], %s632_s21 }
 0x335   : > { %p745_p2 = pnand %p1225_p13, %p1224_p6 }
 0x337   : > { %894 = dma.done.wait (!%p745_p2), %s633_s14, 512  }
 0x338   : > { %896 = vsyncadd (!%p745_p2), %s633_s14, 4294966784  ;;  %s21_s23 = sadd.s32 1, %s919_s23   ;;  %s1226_s18 = smov %s903_s19 }
 0x339   : > { %p18_p5 = scmp.ge.s32.totalorder %s21_s23, 4   ;;  %s1227_s19 = smov %s907_s20 }
 0x33a   : > { %s1228_s20 = smov %s1016_s7  ;;  %s1229_s21 = smov %s915_s22 }
 0x33b   : > { %s1230_s22 = smov %s1232_s26  ;;  %20 = sbr.rel (!%p18_p5) target bundleno = 6 (0x6), region = 85 }
 0x342   :  { %638 = vsyncpa [#allocation3], 1 }
 0x343   :  { %640 = vsyncpa [#allocation3 + $0x1], 1 }
 0x344   :  { %641 = vsyncpa [#allocation4], 1 }
 0x345   :  { %643 = vsyncpa [#allocation4 + $0x1], 1 }

</bundles_post_ra>
